<compile_context>
chip_gen: v5e
topology: v5e:2x2
jax: 0.10.0
libtpu: 0.0.40
codegen_flags: <defaults>
</compile_context>

<pallas_src>
import functools

import jax
import jax.numpy as jnp
from jax.experimental import pallas as pl
from jax.experimental.pallas import tpu as pltpu

BN_EPS = 1e-5
LANE = 128


def _branchnet_kernel(x_ref, w1_ref, b1_ref, w2_ref, b2_ref, o_ref, *, approx_sigmoid):
    """out = sigmoid(x @ W1 + b1) @ W2 + b2 for one batch tile.

    x_ref : [TM, F]      (f32 or bf16)
    w1_ref: [F, Hp]      (same dtype as x)
    b1_ref: [1, Hp]      f32
    w2_ref: [Hp, Cp]     (same dtype as x)
    b2_ref: [1, Cp]      f32
    o_ref : [TM, Cp]     f32 (lane-dense, Cp multiple of 128)
    """
    # Linear 1 (BN0/BN1 pre-folded): MXU matmul, f32 accumulation.
    z = jnp.dot(x_ref[...], w1_ref[...], preferred_element_type=jnp.float32)
    z = z + b1_ref[...]

    # Sigmoid: exp on the EUP; reciprocal on the EUP too when approx is OK.
    denom = 1.0 + jnp.exp(-z)
    if approx_sigmoid:
        s = pl.reciprocal(denom, approx=True)
    else:
        s = 1.0 / denom

    # Linear 2 (BN2 pre-folded).
    out = jnp.dot(s.astype(w2_ref.dtype), w2_ref[...],
                  preferred_element_type=jnp.float32)
    o_ref[...] = (out + b2_ref[...]).astype(o_ref.dtype)


def fold_branchnet_params(w1, w2, bn0, bn1, bn2, *, matmul_dtype=jnp.float32):
    """One-time (weight-load time) folding of the three eval-mode BatchNorms
    into the two linear layers, plus lane padding of H and C to multiples of 128.

    w1: [H, F], w2: [C, H]; bn*: dict(gamma, beta, mean, var).
    """
    H, F = w1.shape
    C = w2.shape[0]

    def scale_bias(p):
        s = p["gamma"].astype(jnp.float32) * jax.lax.rsqrt(p["var"].astype(jnp.float32) + BN_EPS)
        b = p["beta"].astype(jnp.float32) - p["mean"].astype(jnp.float32) * s
        return s, b

    s0, c0 = scale_bias(bn0)
    s1, c1 = scale_bias(bn1)
    s2, c2 = scale_bias(bn2)

    w1f32 = w1.astype(jnp.float32)
    w2f32 = w2.astype(jnp.float32)

    # bn1(bn0(x) @ w1.T) == x @ W1f.T + B1
    W1f = (w1f32 * s0[None, :]) * s1[:, None]      # [H, F]
    B1 = (c0 @ w1f32.T) * s1 + c1                  # [H]
    # bn2(s) @ w2.T == s @ W2f.T + B2
    W2f = w2f32 * s2[None, :]                      # [C, H]
    B2 = c2 @ w2f32.T                              # [C]

    Hp = pl.cdiv(H, LANE) * LANE                   # padded hidden (lane multiple)
    Cp = pl.cdiv(C, LANE) * LANE                   # padded classes (lane-dense output)

    # Zero-padding is exact: padded hidden units get z=0 -> sigmoid=0.5, but the
    # corresponding rows of W2t are zero, so they contribute nothing.
    w1t = jnp.zeros((F, Hp), jnp.float32).at[:, :H].set(W1f.T)
    b1r = jnp.zeros((1, Hp), jnp.float32).at[:, :H].set(B1)
    w2t = jnp.zeros((Hp, Cp), jnp.float32).at[:H, :C].set(W2f.T)
    b2r = jnp.zeros((1, Cp), jnp.float32).at[:, :C].set(B2)

    return {
        "w1t": w1t.astype(matmul_dtype),
        "b1": b1r,
        "w2t": w2t.astype(matmul_dtype),
        "b2": b2r,
        "in_features": F,
        "hidden_pad": Hp,
        "classes": C,
        "classes_pad": Cp,
        "matmul_dtype": matmul_dtype,
    }


def branchnet_forward(x, params, *, block_rows=1024):
    """x: [N, F]. Returns [N, C] f32 logits."""
    N, F = x.shape
    assert F == params["in_features"]
    Hp = params["hidden_pad"]
    Cp = params["classes_pad"]
    C = params["classes"]
    dt = params["matmul_dtype"]

    # Batch tile: multiple of 8 sublanes, capped at block_rows. With the tiny
    # F/Hp/Cp here even TM=8192 fits comfortably inside v7x's 32 MiB scoped VMEM;
    # keep 1024 as a safe default that amortizes the ~600-cycle per-step cost.
    tm = min(block_rows, max(8, pl.cdiv(N, 8) * 8))
    tm = pl.cdiv(tm, 8) * 8
    n_pad = pl.cdiv(N, tm) * tm

    x_in = x.astype(dt)
    if n_pad != N:
        x_in = jnp.zeros((n_pad, F), dt).at[:N].set(x_in)

    kernel = functools.partial(
        _branchnet_kernel, approx_sigmoid=(dt != jnp.float32)
    )

    out = pl.pallas_call(
        kernel,
        out_shape=jax.ShapeDtypeStruct((n_pad, Cp), jnp.float32),
        grid_spec=pltpu.PrefetchScalarGridSpec(
            num_scalar_prefetch=0,
            grid=(n_pad // tm,),
            in_specs=[
                pl.BlockSpec((tm, F), lambda i: (i, 0)),    # x tile (streams over batch)
                pl.BlockSpec((F, Hp), lambda i: (0, 0)),    # W1' (VMEM-resident)
                pl.BlockSpec((1, Hp), lambda i: (0, 0)),    # b1'
                pl.BlockSpec((Hp, Cp), lambda i: (0, 0)),   # W2'
                pl.BlockSpec((1, Cp), lambda i: (0, 0)),    # b2'
            ],
            out_specs=pl.BlockSpec((tm, Cp), lambda i: (i, 0)),  # lane-dense output
        ),
        compiler_params=pltpu.CompilerParams(
            dimension_semantics=("parallel",),
            vmem_limit_bytes=32 * 1024 * 1024,
        ),
    )(x_in, params["w1t"], params["b1"], params["w2t"], params["b2"])

    return out[:N, :C]


def _reference(x, w1, w2, bn0, bn1, bn2):
    def bn(v, p):
        return (v - p["mean"]) * jax.lax.rsqrt(p["var"] + BN_EPS) * p["gamma"] + p["beta"]

    h = bn(x, bn0)
    h = h @ w1.T
    h = bn(h, bn1)
    h = jax.nn.sigmoid(h)
    h = bn(h, bn2)
    return h @ w2.T


if __name__ == "__main__":
    # Small, forward-consistent shapes: batch=8, in_features=32, hidden=64, classes=8
    N, F, H, C = 8, 32, 64, 8

    key = jax.random.PRNGKey(0)
    kx, kw1, kmask, kw2, km0, kv0, km1, kv1, km2, kv2 = jax.random.split(key, 10)

    x = jax.random.normal(kx, (N, F), dtype=jnp.float32)

    # w1 built from tree paths is sparse; emulate deterministically with a mask.
    w1_dense = jax.random.normal(kw1, (H, F), dtype=jnp.float32) / jnp.sqrt(F)
    mask = (jax.random.uniform(kmask, (H, F)) < 0.3).astype(jnp.float32)
    w1 = w1_dense * mask
    w2 = jax.random.normal(kw2, (C, H), dtype=jnp.float32) / jnp.sqrt(F)

    def bn_params(dim, kmean, kvar):
        return {
            "gamma": jnp.ones((dim,), jnp.float32),
            "beta": jnp.zeros((dim,), jnp.float32),
            "mean": 0.1 * jax.random.normal(kmean, (dim,), dtype=jnp.float32),
            "var": 1.0 + 0.1 * jax.random.uniform(kvar, (dim,), dtype=jnp.float32),
        }

    bn0 = bn_params(F, km0, kv0)
    bn1 = bn_params(H, km1, kv1)
    bn2 = bn_params(H, km2, kv2)

    ref = _reference(x, w1, w2, bn0, bn1, bn2)

    # --- f32 path (exact: tight check vs. reference) -------------------------
    p_f32 = fold_branchnet_params(w1, w2, bn0, bn1, bn2, matmul_dtype=jnp.float32)
    out_f32 = jax.block_until_ready(branchnet_forward(x, p_f32))
    assert out_f32.shape == (N, C)
    assert jnp.allclose(out_f32, ref, atol=1e-4, rtol=1e-4), "f32 mismatch vs reference"

    # --- bf16 matmul path (perf path: MXU bf16 + approx EUP reciprocal) ------
    p_bf16 = fold_branchnet_params(w1, w2, bn0, bn1, bn2, matmul_dtype=jnp.bfloat16)
    out_bf16 = jax.block_until_ready(branchnet_forward(x, p_bf16))
    assert out_bf16.shape == (N, C)
    assert jnp.allclose(out_bf16, ref, atol=5e-2, rtol=5e-2), "bf16 mismatch vs reference"

    print("KERNEL_OK")
</pallas_src>

<mosaic_0001>
module attributes {stable_mosaic.version = 11 : i64} {
  func.func @_branchnet_kernel(%arg0: i32, %arg1: memref<8x32xf32, #tpu.memory_space<vmem>>, %arg2: memref<32x128xf32, #tpu.memory_space<vmem>>, %arg3: memref<1x128xf32, #tpu.memory_space<vmem>>, %arg4: memref<128x128xf32, #tpu.memory_space<vmem>>, %arg5: memref<1x128xf32, #tpu.memory_space<vmem>>, %arg6: memref<8x128xf32, #tpu.memory_space<vmem>>) attributes {dimension_semantics = [#tpu.dimension_semantics<parallel>], iteration_bounds = array<i64: 1>, scalar_prefetch = 0 : i64, scratch_operands = 0 : i64, tpu.core_type = #tpu.core_type<tc>, window_params = [{transform_indices = @transform_0, window_bounds = array<i64: 8, 32>}, {pipeline_mode = #tpu.pipeline_mode<synchronous>, transform_indices = @transform_1, window_bounds = array<i64: 32, 128>}, {pipeline_mode = #tpu.pipeline_mode<synchronous>, transform_indices = @transform_2, window_bounds = array<i64: 1, 128>}, {pipeline_mode = #tpu.pipeline_mode<synchronous>, transform_indices = @transform_3, window_bounds = array<i64: 128, 128>}, {pipeline_mode = #tpu.pipeline_mode<synchronous>, transform_indices = @transform_4, window_bounds = array<i64: 1, 128>}, {transform_indices = @transform_5, window_bounds = array<i64: 8, 128>}]} {
    %c0 = arith.constant 0 : index
    %c0_0 = arith.constant 0 : index
    %0 = vector.load %arg1[%c0, %c0_0] : memref<8x32xf32, #tpu.memory_space<vmem>>, vector<8x32xf32>
    %c0_1 = arith.constant 0 : index
    %c0_2 = arith.constant 0 : index
    %1 = vector.load %arg2[%c0_1, %c0_2] : memref<32x128xf32, #tpu.memory_space<vmem>>, vector<32x128xf32>
    %cst = arith.constant dense<0.000000e+00> : vector<8x128xf32>
    %2 = tpu.matmul %0, %1, %cst {dimension_numbers = #tpu.dot_dimension_numbers<[1], [0], [0], [1], [0, 0, 1, 1], [], []>} : vector<8x32xf32>, vector<32x128xf32>, vector<8x128xf32> -> vector<8x128xf32>
    %c0_3 = arith.constant 0 : index
    %c0_4 = arith.constant 0 : index
    %3 = vector.load %arg3[%c0_3, %c0_4] : memref<1x128xf32, #tpu.memory_space<vmem>>, vector<1x128xf32>
    %4 = vector.broadcast %3 : vector<1x128xf32> to vector<8x128xf32>
    %5 = arith.addf %2, %4 : vector<8x128xf32>
    %cst_5 = arith.constant 0.000000e+00 : f32
    %6 = vector.broadcast %cst_5 : f32 to vector<8x128xf32>
    %7 = arith.subf %6, %5 : vector<8x128xf32>
    %8 = math.exp %7 : vector<8x128xf32>
    %cst_6 = arith.constant 1.000000e+00 : f32
    %9 = vector.broadcast %cst_6 : f32 to vector<8x128xf32>
    %10 = arith.addf %9, %8 : vector<8x128xf32>
    %cst_7 = arith.constant 1.000000e+00 : f32
    %11 = vector.broadcast %cst_7 : f32 to vector<8x128xf32>
    %12 = arith.divf %11, %10 : vector<8x128xf32>
    %c0_8 = arith.constant 0 : index
    %c0_9 = arith.constant 0 : index
    %13 = vector.load %arg4[%c0_8, %c0_9] : memref<128x128xf32, #tpu.memory_space<vmem>>, vector<128x128xf32>
    %cst_10 = arith.constant dense<0.000000e+00> : vector<8x128xf32>
    %14 = tpu.matmul %12, %13, %cst_10 {dimension_numbers = #tpu.dot_dimension_numbers<[1], [0], [0], [1], [0, 0, 1, 1], [], []>} : vector<8x128xf32>, vector<128x128xf32>, vector<8x128xf32> -> vector<8x128xf32>
    %c0_11 = arith.constant 0 : index
    %c0_12 = arith.constant 0 : index
    %15 = vector.load %arg5[%c0_11, %c0_12] : memref<1x128xf32, #tpu.memory_space<vmem>>, vector<1x128xf32>
    %16 = vector.broadcast %15 : vector<1x128xf32> to vector<8x128xf32>
    %17 = arith.addf %14, %16 : vector<8x128xf32>
    %c0_13 = arith.constant 0 : index
    %c0_14 = arith.constant 0 : index
    %18 = vector.load %arg6[%c0_13, %c0_14] : memref<8x128xf32, #tpu.memory_space<vmem>>, vector<8x128xf32>
    tpu.vector_store %arg6[%c0_13, %c0_14], %17 {strides = array<i32>} : memref<8x128xf32, #tpu.memory_space<vmem>>, vector<8x128xf32>,
    return
  }
  func.func @transform_0(%arg0: i32) -> (i32, i32) {
    %c0_i32 = arith.constant 0 : i32
    %c0_i32_0 = arith.constant 0 : i32
    return %arg0, %c0_i32 : i32, i32
  }
  func.func @transform_1(%arg0: i32) -> (i32, i32) {
    %c0_i32 = arith.constant 0 : i32
    %c0_i32_0 = arith.constant 0 : i32
    %c0_i32_1 = arith.constant 0 : i32
    return %c0_i32, %c0_i32_0 : i32, i32
  }
  func.func @transform_2(%arg0: i32) -> (i32, i32) {
    %c0_i32 = arith.constant 0 : i32
    %c0_i32_0 = arith.constant 0 : i32
    %c0_i32_1 = arith.constant 0 : i32
    return %c0_i32, %c0_i32_0 : i32, i32
  }
  func.func @transform_3(%arg0: i32) -> (i32, i32) {
    %c0_i32 = arith.constant 0 : i32
    %c0_i32_0 = arith.constant 0 : i32
    %c0_i32_1 = arith.constant 0 : i32
    return %c0_i32, %c0_i32_0 : i32, i32
  }
  func.func @transform_4(%arg0: i32) -> (i32, i32) {
    %c0_i32 = arith.constant 0 : i32
    %c0_i32_0 = arith.constant 0 : i32
    %c0_i32_1 = arith.constant 0 : i32
    return %c0_i32, %c0_i32_0 : i32, i32
  }
  func.func @transform_5(%arg0: i32) -> (i32, i32) {
    %c0_i32 = arith.constant 0 : i32
    %c0_i32_0 = arith.constant 0 : i32
    return %arg0, %c0_i32 : i32, i32
  }
}

</mosaic_0001>

<bundles_post_ra>
// kernel: tpu_custom_call.1
= control target key start
LH: loop header
LB: loop body
LE: loop exit
PB: predicated region body
PF: predicated region fallthrough
CT: control target
= control target key end

     0   :  { %10 = vsyncpa [#allocation3], 0  ;;  %s346_s0 = inlined_call_operand.hbm [shape: f32[8,32], index: 0, kind: input, shape index: {}]   ;;  %s347_s1 = inlined_call_operand.hbm [shape: f32[32,128], index: 1, kind: input, shape index: {}]   ;;  %s348_s2 = inlined_call_operand.vmem [shape: f32[1,128], index: 2, kind: input, shape index: {}]   ;;  %s349_s3 = inlined_call_operand.hbm [shape: f32[128,128], index: 3, kind: input, shape index: {}]   ;;  %s350_s4 = inlined_call_operand.vmem [shape: f32[1,128], index: 4, kind: input, shape index: {}]   ;;  %s351_s5 = inlined_call_operand.hbm [shape: f32[8,128], index: 5, kind: output, shape index: {}]  }
   0x1   :  { %11 = vsyncpa [#allocation6], 0  ;;  %s28_s20 = sshll.u32 %s347_s1, 4  ;;  %s29_s20 = int_to_ptr.hbm [resolvable:$true] %s28_s20 }
   0x2   :  { %12 = vsyncpa [#allocation4], 0  ;;  %s292_s21 = smov [#allocation5]   ;;  %s18_s25 = sshll.u32 %s346_s0, 4  ;;  %s19_s25 = int_to_ptr.hbm [resolvable:$true] %s18_s25 }
   0x3   :  { %s30_s22 = sshll.u32 %s292_s21, 4  ;;  %s293_s26 = smov 128   ;;  %s31_s22 = int_to_ptr.vmem [resolvable:$true] %s30_s22 }
   0x4   :  { %s294_s27 = smov 8   ;;  %s295_s28 = smov [#allocation2]  }
   0x5   :  { %36 = dma.hbm_to_vmem [thread:$0]  %s29_s20, 512, %s31_s22, [#allocation6], %s293_s26, %s293_s26, %s294_s27  }
   0x6   :  { %s20_s29 = sshll.u32 %s295_s28, 4  ;;  %s43_s7 = sshll.u32 %s349_s3, 4  ;;  %s21_s29 = int_to_ptr.vmem [resolvable:$true] %s20_s29  ;;  %s44_s7 = int_to_ptr.hbm [resolvable:$true] %s43_s7 }
   0x7   :  { %23 = dma.hbm_to_vmem [thread:$0]  %s19_s25, 128, %s21_s29, [#allocation3]  }
   0x8   :  { %s296_s1 = smov [#allocation7]  }
   0x9   :  { %s45_s8 = sshll.u32 %s296_s1, 4  ;;  %s46_s8 = int_to_ptr.vmem [resolvable:$true] %s45_s8 }
   0xa   :  { %51 = dma.hbm_to_vmem [thread:$0]  %s44_s7, 2048, %s46_s8, [#allocation6], %s293_s26, %s293_s26, %s294_s27  }
   0xb   :  { %286 = dma.done.wait [#allocation3], 128  }
   0xc   :  { %287 = vsyncadd [#allocation3], 4294967168 }
   0xd   :  { %288 = dma.done.wait [#allocation6], 2560  }
   0xe   :  { %289 = vsyncadd [#allocation6], 4294964736  ;;  %v70_v0 = vld [vmem:[#allocation5 + $0x18] sm:$0xff]  ;;  %v69_v1 = vld [vmem:[#allocation5 + $0x10] sm:$0xff]  ;;  %vm75_vm0 = vcmask 261120   ;;  %s297_s10 = smov [#allocation8]  }
   0xf   :  { %91 = vmatpush.msra.mxu0 %v70_v0  ;;  %v68_v2 = vld [vmem:[#allocation5 + $0x8] sm:$0xff]  ;;  %v67_v3 = vld [vmem:[#allocation5] sm:$0xff]  ;;  %v66_v4 = vld [vmem:[#allocation2] sm:$0xff]  ;;  %s164_s11 = sshll.u32 %s297_s10, 4  ;;  %s166_s14 = sshll.u32 %s351_s5, 4  ;;  %s165_s11 = int_to_ptr.vmem [resolvable:$true] %s164_s11  ;;  %s167_s14 = int_to_ptr.hbm [resolvable:$true] %s166_s14 }
  0x10   :  { %v133_v5 = vld [vmem:[#allocation7 + $0x78] sm:$0xff]  ;;  %v132_v6 = vld [vmem:[#allocation7 + $0x70] sm:$0xff]  ;;  %v131_v7 = vld [vmem:[#allocation7 + $0x68] sm:$0xff] }
  0x11   :  { %92 = vmatpush.msra.mxu0 %v69_v1  ;;  %138 = vmatpush.msra.mxu1 %v133_v5  ;;  %v130_v8 = vld [vmem:[#allocation7 + $0x60] sm:$0xff]  ;;  %v129_v9 = vld [vmem:[#allocation7 + $0x58] sm:$0xff]  ;;  %v128_v10 = vld [vmem:[#allocation7 + $0x50] sm:$0xff] }
  0x12   :  { %v127_v11 = vld [vmem:[#allocation7 + $0x48] sm:$0xff]  ;;  %v126_v12 = vld [vmem:[#allocation7 + $0x40] sm:$0xff]  ;;  %v125_v13 = vld [vmem:[#allocation7 + $0x38] sm:$0xff] }
  0x13   :  { %93 = vmatpush.msra.mxu0 %v68_v2  ;;  %139 = vmatpush.msra.mxu1 %v132_v6  ;;  %v124_v14 = vld [vmem:[#allocation7 + $0x30] sm:$0xff]  ;;  %v123_v15 = vld [vmem:[#allocation7 + $0x28] sm:$0xff]  ;;  %v122_v16 = vld [vmem:[#allocation7 + $0x20] sm:$0xff] }
  0x14   :  { %v121_v17 = vld [vmem:[#allocation7 + $0x18] sm:$0xff]  ;;  %v120_v18 = vld [vmem:[#allocation7 + $0x10] sm:$0xff]  ;;  %v119_v19 = vld [vmem:[#allocation7 + $0x8] sm:$0xff] }
  0x15   :  { %94 = vmatpush.msra.mxu0 %v67_v3  ;;  %140 = vmatpush.msra.mxu1 %v131_v7  ;;  %v184_v20 = vld [vmem:[%s348_s2] ss:$0 sm:$0xff]  ;;  %v118_v21 = vld [vmem:[#allocation7] sm:$0xff] }
  0x16   :  { %177 = vmatmul.msk.f32.vlgmr.msra.gmra.mxu0 %vm75_vm0, %v66_v4  ;;  %v185_v38 = vld [vmem:[%s350_s4] ss:$0 sm:$0xff] }
  0x17   :  { %141 = vmatpush.msra.mxu1 %v130_v8 }
  0x19   :  { %142 = vmatpush.msra.mxu1 %v129_v9 }
  0x1b   :  { %143 = vmatpush.msra.mxu1 %v128_v10 }
  0x1d   :  { %144 = vmatpush.msra.mxu1 %v127_v11 }
  0x1f   :  { %145 = vmatpush.msra.mxu1 %v126_v12 }
  0x21   :  { %146 = vmatpush.msra.mxu1 %v125_v13 }
  0x23   :  { %147 = vmatpush.msra.mxu1 %v124_v14 }
  0x25   :  { %148 = vmatpush.msra.mxu1 %v123_v15 }
  0x27   :  { %149 = vmatpush.msra.mxu1 %v122_v16 }
  0x29   :  { %150 = vmatpush.msra.mxu1 %v121_v17 }
  0x2b   :  { %151 = vmatpush.msra.mxu1 %v120_v18 }
  0x2d   :  { %152 = vmatpush.msra.mxu1 %v119_v19 }
  0x2f   :  { %153 = vmatpush.msra.mxu1 %v118_v21 }
  0x93   :  { %v96_v22 = vpop.f32.mrf.mxu0 }
  0x94   :  { %v97_v23 = vadd.f32 %v184_v20, %v96_v22 }
  0x96   :  { %v99_v24 = vsub.f32 0.0, %v97_v23 }
  0x98   :  { %v100_v25 = vmul.f32 1.442695, %v99_v24 }
  0x9a   :  { %186 = vpow2.f32 %v100_v25 }
  0xa0   :  { %v187_v26 = vpop.eup %186 }
  0xa1   :  { %v102_v27 = vadd.f32 1.0, %v187_v26 }
  0xa3   :  { %188 = vrcp.f32 %v102_v27  ;;  %v114_v31 = vand.u32 2147483648, %v102_v27  ;;  %v112_v33 = vand.u32 2147483647, %v102_v27  ;;  %vm108_vm2 = vweird.f32 %v102_v27 }
  0xa5   :  { %v115_v35 = vor.u32 1.1754944e-38, %v114_v31  ;;  %vm113_vm4 = vcmp.eq.f32.partialorder %v112_v33, 8.507059e+37 }
  0xa9   :  { %v189_v28 = vpop.eup %188 }
  0xaa   :  { %v104_v29 = vmul.f32 %v189_v28, %v102_v27  ;;  %vm109_vm1 = vweird.f32 %v189_v28 }
  0xab   :  { %vm110_vm3 = vmor %vm108_vm2, %vm109_vm1 }
  0xac   :  { %v105_v30 = vsub.f32 1.0, %v104_v29 }
  0xae   :  { %v106_v32 = vmul.f32 %v189_v28, %v105_v30 }
  0xb0   :  { %v107_v34 = vadd.f32 %v189_v28, %v106_v32 }
  0xb2   :  { %v111_v36 = vsel %vm110_vm3, %v189_v28, %v107_v34 }
  0xb3   :  { %v116_v37 = vsel %vm113_vm4, %v115_v35, %v111_v36 }
  0xb4   :  { %154 = vmatmul.f32.vlgmr.msra.gmra.mxu1 %v116_v37 }
 0x131   :  { %v155_v39 = vpop.f32.mrf.mxu1 }
 0x132   :  { %v156_v40 = vadd.f32 %v185_v38, %v155_v39 }
 0x134   :  { %158 = vst [vmem:[#allocation8] sm:$0xff] %v156_v40 }
 0x135   :  { %169 = dma.vmem_to_hbm [thread:$0]  %s165_s11, 128, %s167_s14, [#allocation4]  }
 0x136   :  { %290 = dma.done.wait [#allocation4], 128  }
 0x137   :  { %291 = vsyncadd [#allocation4], 4294967168 }
 0x138   :  { %174 = vsyncpa [#allocation3], 1 }
 0x139   :  { %175 = vsyncpa [#allocation6], 1 }
 0x13a   :  { %176 = vsyncpa [#allocation4], 1 }

</bundles_post_ra>
